<compile_context>
chip_gen: v6e
topology: v6e:2x2x1
jax: 0.10.0
libtpu: 0.0.40
codegen_flags: <defaults>
</compile_context>

<pallas_src>
import functools

import jax
import jax.numpy as jnp
from jax.experimental import pallas as pl
from jax.experimental.pallas import tpu as pltpu

LANE = 128
_TARGET_BLOCK_BYTES = 8 * 1024 * 1024    # ~8 MiB/block amortizes grid-step overhead
_MIN_GRID_BLOCKS = 4                     # keep >=4 steps for pipelining / 2-TC split
_VMEM_LIMIT_BYTES = 48 * 1024 * 1024     # 4 x 8 MiB buffers = 32 MiB < 48 MiB limit


def _tanh_kernel(x_ref, o_ref, *, compute_dtype):
    # compute_dtype is f32 for f32 inputs (and for sub-f32 inputs on v5e where
    # the EUP has no bf16 path); native bf16/f16 on v6e/v7x.
    o_ref[...] = jnp.tanh(x_ref[...].astype(compute_dtype)).astype(o_ref.dtype)


def _native_eup_ok() -> bool:
    """True when the chip's EUP handles bf16/f16 natively (v6e, v7x)."""
    try:
        kind = jax.devices()[0].device_kind.lower()
    except Exception:
        return False
    return not any(t in kind for t in ("v2", "v3", "v4", "v5"))


def _compute_dtype_for(dtype):
    if dtype == jnp.float32:
        return jnp.float32
    return dtype if _native_eup_ok() else jnp.float32


def _tanh_2d(x2d: jax.Array, compute_dtype) -> jax.Array:
    """tanh over a lane-dense (rows, 128) slab via a tiled Pallas kernel."""
    rows, _ = x2d.shape
    itemsize = jnp.dtype(x2d.dtype).itemsize
    # Packed sublane count: 8 for 4-byte, 16 for 2-byte dtypes.
    sub = max(8, 32 // itemsize)

    # Largest block (multiple of the packed sublane count) under the target.
    max_block_rows = max(sub, (_TARGET_BLOCK_BYTES // (LANE * itemsize)) // sub * sub)

    if rows <= sub:
        # Tiny slab: single full-extent block (always layout-legal).
        block_rows = rows
    else:
        # Ensure >= _MIN_GRID_BLOCKS grid steps so DMA/compute pipeline and the
        # grid can shard across both v7x TensorCores, but never below `sub` rows.
        per_min = -(-rows // _MIN_GRID_BLOCKS)        # cdiv(rows, MIN_BLOCKS)
        per_min = -(-per_min // sub) * sub            # round up to sublane multiple
        block_rows = max(sub, min(max_block_rows, per_min))

    grid = (pl.cdiv(rows, block_rows),)
    n = rows * LANE

    kernel = functools.partial(_tanh_kernel, compute_dtype=compute_dtype)
    return pl.pallas_call(
        kernel,
        out_shape=jax.ShapeDtypeStruct((rows, LANE), x2d.dtype),
        grid_spec=pltpu.PrefetchScalarGridSpec(
            num_scalar_prefetch=0,
            grid=grid,
            in_specs=[pl.BlockSpec((block_rows, LANE), lambda i: (i, 0))],
            out_specs=pl.BlockSpec((block_rows, LANE), lambda i: (i, 0)),
        ),
        compiler_params=pltpu.CompilerParams(
            dimension_semantics=("parallel",),
            vmem_limit_bytes=_VMEM_LIMIT_BYTES,
        ),
        cost_estimate=pl.CostEstimate(
            flops=0, transcendentals=n, bytes_accessed=2 * n * itemsize
        ),
    )(x2d)


def pallas_tanh(x: jax.Array) -> jax.Array:
    """Applies tanh elementwise, matching torch.tanh / the CUDA tanh_cuda."""
    if not jnp.issubdtype(x.dtype, jnp.floating):
        raise TypeError(f"pallas_tanh expects a floating dtype, got {x.dtype}")

    orig_shape = x.shape
    n = x.size
    if n == 0:
        return x

    compute_dtype = _compute_dtype_for(x.dtype)

    n_bulk = n - (n % LANE)
    if n_bulk == 0:
        # Fewer than 128 elements: a kernel launch is pure overhead.
        return jnp.tanh(x.astype(compute_dtype)).astype(x.dtype)

    x_flat = jnp.ravel(x)

    if n_bulk == n:
        # Aligned fast path: no pad, no slice, no extra HBM copies.
        out2d = _tanh_2d(x_flat.reshape(n // LANE, LANE), compute_dtype)
        return out2d.reshape(orig_shape)

    # Unaligned: kernel on the aligned bulk, jnp.tanh on the <128-element tail
    # (avoids the full-array pad + trailing-slice HBM round-trips).
    bulk2d = x_flat[:n_bulk].reshape(n_bulk // LANE, LANE)
    out_bulk = _tanh_2d(bulk2d, compute_dtype).reshape(-1)
    tail = jnp.tanh(x_flat[n_bulk:].astype(compute_dtype)).astype(x.dtype)
    return jnp.concatenate([out_bulk, tail]).reshape(orig_shape)


class ModelNew:
    """JAX/Pallas equivalent of the PyTorch ModelNew (elementwise tanh)."""

    def __init__(self):
        self._fn = jax.jit(pallas_tanh)

    def __call__(self, x: jax.Array) -> jax.Array:
        return self._fn(x)


if __name__ == "__main__":
    model = ModelNew()

    # Primary check: aligned NCHW input (matches the PyTorch module's usage).
    x = jax.random.normal(jax.random.PRNGKey(0), (2, 4, 16, 16), dtype=jnp.float32)
    out = jax.block_until_ready(model(x))
    ref = jnp.tanh(x)
    assert out.shape == x.shape and out.dtype == x.dtype
    assert jnp.allclose(out, ref, atol=1e-6), "mismatch vs jnp.tanh reference"

    # Lane-unaligned, smaller than one row: pure tail path.
    x2 = jax.random.normal(jax.random.PRNGKey(1), (3, 5, 7), dtype=jnp.float32)
    out2 = jax.block_until_ready(model(x2))
    assert out2.shape == x2.shape and out2.dtype == x2.dtype
    assert jnp.allclose(out2, jnp.tanh(x2), atol=1e-6), "mismatch on tiny unaligned shape"

    # Lane-unaligned with an aligned bulk: exercises the bulk+tail split.
    x3 = jax.random.normal(jax.random.PRNGKey(2), (17, 31), dtype=jnp.float32)
    out3 = jax.block_until_ready(model(x3))
    assert out3.shape == x3.shape and out3.dtype == x3.dtype
    assert jnp.allclose(out3, jnp.tanh(x3), atol=1e-6), "mismatch on bulk+tail path"

    print("KERNEL_OK")
</pallas_src>

<mosaic_0001>
module attributes {stable_mosaic.version = 11 : i64} {
  func.func @_tanh_kernel(%arg0: i32, %arg1: memref<8x128xf32, #tpu.memory_space<vmem>>, %arg2: memref<8x128xf32, #tpu.memory_space<vmem>>) attributes {dimension_semantics = [#tpu.dimension_semantics<parallel>], iteration_bounds = array<i64: 2>, scalar_prefetch = 0 : i64, scratch_operands = 0 : i64, tpu.core_type = #tpu.core_type<tc>, window_params = [{transform_indices = @transform_0, window_bounds = array<i64: 8, 128>}, {transform_indices = @transform_1, window_bounds = array<i64: 8, 128>}]} {
    %c0 = arith.constant 0 : index
    %c0_0 = arith.constant 0 : index
    %0 = vector.load %arg1[%c0, %c0_0] : memref<8x128xf32, #tpu.memory_space<vmem>>, vector<8x128xf32>
    %1 = math.tanh %0 : vector<8x128xf32>
    %c0_1 = arith.constant 0 : index
    %c0_2 = arith.constant 0 : index
    %2 = vector.load %arg2[%c0_1, %c0_2] : memref<8x128xf32, #tpu.memory_space<vmem>>, vector<8x128xf32>
    tpu.vector_store %arg2[%c0_1, %c0_2], %1 {strides = array<i32>} : memref<8x128xf32, #tpu.memory_space<vmem>>, vector<8x128xf32>,
    return
  }
  func.func @transform_0(%arg0: i32) -> (i32, i32) {
    %c0_i32 = arith.constant 0 : i32
    %c0_i32_0 = arith.constant 0 : i32
    return %arg0, %c0_i32 : i32, i32
  }
  func.func @transform_1(%arg0: i32) -> (i32, i32) {
    %c0_i32 = arith.constant 0 : i32
    %c0_i32_0 = arith.constant 0 : i32
    return %arg0, %c0_i32 : i32, i32
  }
}

</mosaic_0001>

<bundles_post_ra>
// kernel: pallas_tanh.1
= control target key start
LH: loop header
LB: loop body
LE: loop exit
PB: predicated region body
PF: predicated region fallthrough
CT: control target
= control target key end

     0   :  { %s191_s6 = smov 0   ;;  %s211_s0 = inlined_call_operand.vmem [shape: f32[16,128], index: 0, kind: input, shape index: {}]   ;;  %s212_s1 = inlined_call_operand.vmem [shape: f32[16,128], index: 1, kind: output, shape index: {}]  }
   0x1 LB: > { %s168_s7 = sadd.s32 4294967295, %s193_s6   ;;  %p172_p0 = scmp.ge.s32.totalorder %s193_s6, 1  ;;  %s193_s6 = sphi %s191_s6, %s11_s6  }
   0x2   : > { %p86_p1 = scmp.lt.s32.totalorder %s193_s6, 3 }
   0x4   : > { %p87_p2 = pnand %p172_p0, %p86_p1 }
   0x5   : > { %p104_p3 = scmp.lt.s32.totalorder (!%p87_p2), %s168_s7, 1 }
   0x6   : > { %90 = sbr.rel (%p87_p2) target bundleno = 30 (0x1e), region = 24 }
   0xb   : > { %s214_s7 = smov (!%p104_p3, %s168_s7), 1 }
   0xc   : > { %s173_s8 = sshll.u32 %s214_s7, 3 }
   0xd   : > { %s107_s11 = scalar_lea.vmem %s211_s0, %s173_s8  ;;  %s111_s14 = scalar_lea.vmem %s212_s1, %s173_s8 }
   0xe   : > { %v112_v0 = vld [vmem:[%s107_s11] sm:$0xff] }
   0xf   : > { %185 = vtanh.f32 %v112_v0 }
  0x1c   : > { %v186_v1 = vpop.eup %185 }
  0x1d   : > { %114 = vst [vmem:[%s111_s14] sm:$0xff] %v186_v1 }
  0x1e PF: > { %s11_s6 = sadd.s32 1, %s193_s6  }
  0x1f   : > { %p8_p4 = scmp.ge.s32.totalorder %s11_s6, 4  }
  0x21   :  { %10 = sbr.rel (!%p8_p4) target bundleno = 1 (0x1), region = 54 }

</bundles_post_ra>
